<compile_context>
chip_gen: v7x
topology: tpu7x:2x2x1
jax: 0.10.0
libtpu: 0.0.40
codegen_flags: <defaults>
</compile_context>

<pallas_src>
import functools

import jax
import jax.numpy as jnp
from jax.experimental import pallas as pl
from jax.experimental.pallas import tpu as pltpu


def _round_up(x, m):
    return ((x + m - 1) // m) * m


def _choose_hw_tile(hw, c, itemsize, budget_bytes, cap):
    """128-aligned spatial tile T: double-buffered in+out blocks of the scale
    pass (4 * C * T * itemsize) stay under `budget_bytes`, capped at `cap`
    lanes (bigger tiles buy no bandwidth, only VMEM)."""
    hw128 = _round_up(hw, 128)
    max_t = (budget_bytes // (4 * c * itemsize)) // 128 * 128
    # NOTE: for extremely wide layers (C*itemsize > 64 KiB) the T=128 floor can
    # approach the scoped-VMEM limit on v7x; channel tiling would be needed.
    max_t = max(128, min(max_t, cap))
    return min(max_t, hw128)


# ---------------------------------------------------------------------------
# Shared tiny-MLP epilogue:  pooled (C,1) f32 -> scale (C,1) f32.
# Broadcast-multiply + reductions only (no sub-tile dots, no transposes).
#   w1t: (C, S) = fc1.weight.T     b1_row: (1, S)
#   w2 : (C, S) = fc2.weight       b2_col: (C, 1)
# ---------------------------------------------------------------------------
def _excite(pooled, w1t, b1_row, w2, b2_col):
    s1 = jnp.sum(w1t * pooled, axis=0, keepdims=True) + b1_row      # (1, S)
    s1 = jnp.maximum(s1, 0.0)                                       # ReLU
    s2 = jnp.sum(w2 * s1, axis=1, keepdims=True) + b2_col           # (C, 1)
    return jax.nn.sigmoid(s2)                                       # (C, 1)


# ---------------------------------------------------------------------------
# Fast path: whole (C, HW) image per grid step.  Read x once, write once.
# ---------------------------------------------------------------------------
def _fused_se_kernel(x_ref, w1t_ref, b1_ref, w2_ref, b2_ref, o_ref, *, inv_hw):
    x = x_ref[0]                                                     # (C, HW)
    pooled = jnp.sum(x.astype(jnp.float32), axis=1, keepdims=True) * inv_hw
    scale = _excite(pooled, w1t_ref[...], b1_ref[...], w2_ref[...], b2_ref[...])
    o_ref[0] = x * scale.astype(x.dtype)


# ---------------------------------------------------------------------------
# Fallback pass 1: tiled pool with fused MLP epilogue.
#   x tile (1, C, T) -> scale (1, C, 1).  Ragged tail masked in-kernel.
# ---------------------------------------------------------------------------
def _pool_excite_kernel(x_ref, w1t_ref, b1_ref, w2_ref, b2_ref, scale_ref,
                        acc_ref, *, hw, tile, inv_hw):
    t = pl.program_id(1)

    @pl.when(t == 0)
    def _():
        acc_ref[...] = jnp.zeros_like(acc_ref)

    xt = x_ref[0]                                                    # (C, T)
    if hw % tile != 0:
        # Mask the ragged last tile: partial-block reads are undefined.
        lane = jax.lax.broadcasted_iota(jnp.int32, xt.shape, 1)
        xt = jnp.where(t * tile + lane < hw, xt, 0)

    # Lane-wise partial accumulation (VPU adds co-issue with loads); the
    # cross-lane XLU reduce happens once, at the last step.
    n_chunks = tile // 128
    partial = xt[:, 0:128].astype(jnp.float32)
    for i in range(1, n_chunks):
        partial = partial + xt[:, i * 128:(i + 1) * 128].astype(jnp.float32)
    acc_ref[...] += partial

    @pl.when(t == pl.num_programs(1) - 1)
    def _():
        pooled = jnp.sum(acc_ref[...], axis=1, keepdims=True) * inv_hw   # (C,1)
        scale = _excite(pooled, w1t_ref[...], b1_ref[...], w2_ref[...],
                        b2_ref[...])
        scale_ref[0] = scale.astype(scale_ref.dtype)


# ---------------------------------------------------------------------------
# Fallback pass 2: apply the per-channel scale, tiled over the spatial axis.
# Native-dtype multiply; partial last tile needs no mask (OOB stores dropped).
# ---------------------------------------------------------------------------
def _scale_kernel(x_ref, scale_ref, o_ref):
    o_ref[0] = x_ref[0] * scale_ref[0]            # (C, T) * (C, 1) broadcast


def squeeze_excitation(x, w1, b1, w2, b2, *,
                       single_pass_budget_bytes=4 * 1024 * 1024,
                       tile_budget_bytes=16 * 1024 * 1024,
                       max_tile=2048):
    """SE forward.  x: (N, C, H, W); w1: (S, C) (fc1 1x1 conv weight, squeezed);
    b1: (S,); w2: (C, S); b2: (C,).
    Returns sigmoid(fc2(relu(fc1(avgpool(x))))) * x."""
    N, C, H, W = x.shape
    S = w1.shape[0]
    HW = H * W
    itemsize = jnp.dtype(x.dtype).itemsize

    x_flat = x.reshape(N, C, HW)             # free: collapses contiguous dims
    w1t = w1.T.astype(jnp.float32)            # (C, S)
    w2f = w2.astype(jnp.float32)              # (C, S)
    b1_row = b1.reshape(1, S).astype(jnp.float32)
    b2_col = b2.reshape(C, 1).astype(jnp.float32)

    vmem_limit = 32 * 1024 * 1024
    # Tiny full-array weight blocks (block == full dims, so no (8,128) rule).
    weight_specs = [
        pl.BlockSpec((C, S), lambda *_: (0, 0)),
        pl.BlockSpec((1, S), lambda *_: (0, 0)),
        pl.BlockSpec((C, S), lambda *_: (0, 0)),
        pl.BlockSpec((C, 1), lambda *_: (0, 0)),
    ]
    weights = (w1t, b1_row, w2f, b2_col)

    # ---- Fast path: one read + one write of x --------------------------------
    if C * HW * itemsize <= single_pass_budget_bytes:
        out_flat = pl.pallas_call(
            functools.partial(_fused_se_kernel, inv_hw=1.0 / HW),
            out_shape=jax.ShapeDtypeStruct((N, C, HW), x.dtype),
            grid_spec=pltpu.PrefetchScalarGridSpec(
                num_scalar_prefetch=0,
                grid=(N,),
                # (1, C, HW): last two block dims equal the full array dims.
                in_specs=[pl.BlockSpec((1, C, HW), lambda n: (n, 0, 0))]
                         + weight_specs,
                out_specs=pl.BlockSpec((1, C, HW), lambda n: (n, 0, 0)),
            ),
            compiler_params=pltpu.CompilerParams(
                dimension_semantics=("parallel",),
                vmem_limit_bytes=vmem_limit),
            cost_estimate=pl.CostEstimate(
                flops=2 * N * C * HW + 4 * N * C * S,
                transcendentals=N * C,
                bytes_accessed=2 * N * C * HW * itemsize),
        )(x_flat, *weights)
        return out_flat.reshape(N, C, H, W)

    # ---- Fallback: two tiled passes (pool+MLP, then scale) -------------------
    T = _choose_hw_tile(HW, C, itemsize, tile_budget_bytes, max_tile)
    n_tiles = pl.cdiv(HW, T)

    scale = pl.pallas_call(
        functools.partial(_pool_excite_kernel, hw=HW, tile=T, inv_hw=1.0 / HW),
        out_shape=jax.ShapeDtypeStruct((N, C, 1), x.dtype),
        grid_spec=pltpu.PrefetchScalarGridSpec(
            num_scalar_prefetch=0,
            grid=(N, n_tiles),
            in_specs=[pl.BlockSpec((1, C, T), lambda n, t: (n, 0, t))]
                     + weight_specs,
            out_specs=pl.BlockSpec((1, C, 1), lambda n, t: (n, 0, 0)),
            scratch_shapes=[pltpu.VMEM((C, 128), jnp.float32)],
        ),
        compiler_params=pltpu.CompilerParams(
            dimension_semantics=("parallel", "arbitrary"),
            vmem_limit_bytes=vmem_limit),
        cost_estimate=pl.CostEstimate(
            flops=N * C * HW + 4 * N * C * S,
            transcendentals=N * C,
            bytes_accessed=N * C * HW * itemsize + N * C * itemsize),
    )(x_flat, *weights)

    out_flat = pl.pallas_call(
        _scale_kernel,
        out_shape=jax.ShapeDtypeStruct((N, C, HW), x.dtype),
        grid_spec=pltpu.PrefetchScalarGridSpec(
            num_scalar_prefetch=0,
            grid=(N, n_tiles),
            in_specs=[pl.BlockSpec((1, C, T), lambda n, t: (n, 0, t)),
                      pl.BlockSpec((1, C, 1), lambda n, t: (n, 0, 0))],
            out_specs=pl.BlockSpec((1, C, T), lambda n, t: (n, 0, t)),
        ),
        compiler_params=pltpu.CompilerParams(
            dimension_semantics=("parallel", "parallel"),
            vmem_limit_bytes=vmem_limit),
        cost_estimate=pl.CostEstimate(
            flops=N * C * HW,
            transcendentals=0,
            bytes_accessed=2 * N * C * HW * itemsize),
    )(x_flat, scale)

    return out_flat.reshape(N, C, H, W)


def _reference(x, w1, b1, w2, b2):
    # Pure-JAX reference of the PyTorch forward.
    pooled = jnp.mean(x, axis=(2, 3))                            # (N, C)
    s1 = jnp.maximum(pooled @ w1.T + b1, 0.0)                    # (N, S)
    s2 = jax.nn.sigmoid(s1 @ w2.T + b2)                          # (N, C)
    return x * s2[:, :, None, None]


if __name__ == "__main__":
    key = jax.random.PRNGKey(0)
    kx, k1, k2, k3, k4, kx2 = jax.random.split(key, 6)

    N, C, S, H, W = 2, 4, 2, 16, 16
    x = jax.random.normal(kx, (N, C, H, W), dtype=jnp.float32)
    # 1x1 conv weights collapsed to matrices (fc1.weight (S,C,1,1) -> (S,C)).
    w1 = jax.random.normal(k1, (S, C), dtype=jnp.float32) * 0.5
    b1 = jax.random.normal(k2, (S,), dtype=jnp.float32) * 0.1
    w2 = jax.random.normal(k3, (C, S), dtype=jnp.float32) * 0.5
    b2 = jax.random.normal(k4, (C,), dtype=jnp.float32) * 0.1

    # Fast single-pass path.
    out = jax.block_until_ready(squeeze_excitation(x, w1, b1, w2, b2))
    ref = _reference(x, w1, b1, w2, b2)
    assert out.shape == x.shape
    assert jnp.allclose(out, ref, atol=1e-5, rtol=1e-5)

    # Forced two-pass fallback with a ragged spatial tail (HW=400, T=128).
    H2, W2 = 20, 20
    x2 = jax.random.normal(kx2, (1, C, H2, W2), dtype=jnp.float32)
    out2 = jax.block_until_ready(
        squeeze_excitation(x2, w1, b1, w2, b2,
                           single_pass_budget_bytes=0, max_tile=128))
    ref2 = _reference(x2, w1, b1, w2, b2)
    assert out2.shape == x2.shape
    assert jnp.allclose(out2, ref2, atol=1e-5, rtol=1e-5)

    print("KERNEL_OK")
</pallas_src>

<mosaic_0001>
module attributes {stable_mosaic.version = 11 : i64} {
  func.func @_fused_se_kernel(%arg0: i32, %arg1: memref<1x4x256xf32, #tpu.memory_space<vmem>>, %arg2: memref<4x2xf32, #tpu.memory_space<vmem>>, %arg3: memref<1x2xf32, #tpu.memory_space<vmem>>, %arg4: memref<4x2xf32, #tpu.memory_space<vmem>>, %arg5: memref<4x1xf32, #tpu.memory_space<vmem>>, %arg6: memref<1x4x256xf32, #tpu.memory_space<vmem>>) attributes {dimension_semantics = [#tpu.dimension_semantics<parallel>], iteration_bounds = array<i64: 2>, scalar_prefetch = 0 : i64, scratch_operands = 0 : i64, tpu.core_type = #tpu.core_type<tc>, window_params = [{transform_indices = @transform_0, window_bounds = array<i64: 1, 4, 256>}, {pipeline_mode = #tpu.pipeline_mode<synchronous>, transform_indices = @transform_1, window_bounds = array<i64: 4, 2>}, {pipeline_mode = #tpu.pipeline_mode<synchronous>, transform_indices = @transform_2, window_bounds = array<i64: 1, 2>}, {pipeline_mode = #tpu.pipeline_mode<synchronous>, transform_indices = @transform_3, window_bounds = array<i64: 4, 2>}, {pipeline_mode = #tpu.pipeline_mode<synchronous>, transform_indices = @transform_4, window_bounds = array<i64: 4, 1>}, {transform_indices = @transform_5, window_bounds = array<i64: 1, 4, 256>}]} {
    %c0 = arith.constant 0 : index
    %c0_0 = arith.constant 0 : index
    %c0_1 = arith.constant 0 : index
    %0 = vector.load %arg1[%c0, %c0_0, %c0_1] : memref<1x4x256xf32, #tpu.memory_space<vmem>>, vector<1x4x256xf32>
    %1 = vector.shape_cast %0 : vector<1x4x256xf32> to vector<4x256xf32>
    %cst = arith.constant dense<0.000000e+00> : vector<4xf32>
    %2 = vector.multi_reduction <add>, %1, %cst [1] : vector<4x256xf32> to vector<4xf32>
    %3 = vector.shape_cast %2 : vector<4xf32> to vector<4x1xf32>
    %cst_2 = arith.constant 3.906250e-03 : f32
    %4 = vector.broadcast %cst_2 : f32 to vector<4x1xf32>
    %5 = arith.mulf %3, %4 : vector<4x1xf32>
    %c0_3 = arith.constant 0 : index
    %c0_4 = arith.constant 0 : index
    %6 = vector.load %arg2[%c0_3, %c0_4] : memref<4x2xf32, #tpu.memory_space<vmem>>, vector<4x2xf32>
    %c0_5 = arith.constant 0 : index
    %c0_6 = arith.constant 0 : index
    %7 = vector.load %arg3[%c0_5, %c0_6] : memref<1x2xf32, #tpu.memory_space<vmem>>, vector<1x2xf32>
    %c0_7 = arith.constant 0 : index
    %c0_8 = arith.constant 0 : index
    %8 = vector.load %arg4[%c0_7, %c0_8] : memref<4x2xf32, #tpu.memory_space<vmem>>, vector<4x2xf32>
    %c0_9 = arith.constant 0 : index
    %c0_10 = arith.constant 0 : index
    %9 = vector.load %arg5[%c0_9, %c0_10] : memref<4x1xf32, #tpu.memory_space<vmem>>, vector<4x1xf32>
    %10 = vector.broadcast %5 : vector<4x1xf32> to vector<4x2xf32>
    %11 = arith.mulf %6, %10 : vector<4x2xf32>
    %cst_11 = arith.constant dense<0.000000e+00> : vector<2xf32>
    %12 = vector.multi_reduction <add>, %11, %cst_11 [0] : vector<4x2xf32> to vector<2xf32>
    %13 = vector.shape_cast %12 : vector<2xf32> to vector<1x2xf32>
    %14 = arith.addf %13, %7 : vector<1x2xf32>
    %cst_12 = arith.constant 0.000000e+00 : f32
    %15 = vector.broadcast %cst_12 : f32 to vector<1x2xf32>
    %16 = arith.maximumf %14, %15 : vector<1x2xf32>
    %17 = vector.broadcast %16 : vector<1x2xf32> to vector<4x2xf32>
    %18 = arith.mulf %8, %17 : vector<4x2xf32>
    %cst_13 = arith.constant dense<0.000000e+00> : vector<4xf32>
    %19 = vector.multi_reduction <add>, %18, %cst_13 [1] : vector<4x2xf32> to vector<4xf32>
    %20 = vector.shape_cast %19 : vector<4xf32> to vector<4x1xf32>
    %21 = arith.addf %20, %9 : vector<4x1xf32>
    %22 = arith.negf %21 : vector<4x1xf32>
    %23 = math.exp %22 : vector<4x1xf32>
    %cst_14 = arith.constant 1.000000e+00 : f32
    %24 = vector.broadcast %cst_14 : f32 to vector<4x1xf32>
    %25 = arith.addf %24, %23 : vector<4x1xf32>
    %26 = arith.divf %24, %25 : vector<4x1xf32>
    %27 = vector.broadcast %26 : vector<4x1xf32> to vector<4x256xf32>
    %28 = arith.mulf %1, %27 : vector<4x256xf32>
    %c0_15 = arith.constant 0 : index
    %c0_16 = arith.constant 0 : index
    %c0_17 = arith.constant 0 : index
    %29 = vector.load %arg6[%c0_15, %c0_16, %c0_17] : memref<1x4x256xf32, #tpu.memory_space<vmem>>, vector<1x4x256xf32>
    %30 = vector.shape_cast %29 : vector<1x4x256xf32> to vector<4x256xf32>
    %31 = vector.shape_cast %28 : vector<4x256xf32> to vector<1x4x256xf32>
    tpu.vector_store %arg6[%c0_15, %c0_16, %c0_17], %31 {strides = array<i32>} : memref<1x4x256xf32, #tpu.memory_space<vmem>>, vector<1x4x256xf32>,
    return
  }
  func.func @transform_0(%arg0: i32) -> (i32, i32, i32) {
    %c0_i32 = arith.constant 0 : i32
    %c0_i32_0 = arith.constant 0 : i32
    %c0_i32_1 = arith.constant 0 : i32
    return %arg0, %c0_i32, %c0_i32_0 : i32, i32, i32
  }
  func.func @transform_1(%arg0: i32) -> (i32, i32) {
    %c0_i32 = arith.constant 0 : i32
    %c0_i32_0 = arith.constant 0 : i32
    %c0_i32_1 = arith.constant 0 : i32
    return %c0_i32, %c0_i32_0 : i32, i32
  }
  func.func @transform_2(%arg0: i32) -> (i32, i32) {
    %c0_i32 = arith.constant 0 : i32
    %c0_i32_0 = arith.constant 0 : i32
    %c0_i32_1 = arith.constant 0 : i32
    return %c0_i32, %c0_i32_0 : i32, i32
  }
  func.func @transform_3(%arg0: i32) -> (i32, i32) {
    %c0_i32 = arith.constant 0 : i32
    %c0_i32_0 = arith.constant 0 : i32
    %c0_i32_1 = arith.constant 0 : i32
    return %c0_i32, %c0_i32_0 : i32, i32
  }
  func.func @transform_4(%arg0: i32) -> (i32, i32) {
    %c0_i32 = arith.constant 0 : i32
    %c0_i32_0 = arith.constant 0 : i32
    %c0_i32_1 = arith.constant 0 : i32
    return %c0_i32, %c0_i32_0 : i32, i32
  }
  func.func @transform_5(%arg0: i32) -> (i32, i32, i32) {
    %c0_i32 = arith.constant 0 : i32
    %c0_i32_0 = arith.constant 0 : i32
    %c0_i32_1 = arith.constant 0 : i32
    return %arg0, %c0_i32, %c0_i32_0 : i32, i32, i32
  }
}

</mosaic_0001>

<bundles_post_ra>
// kernel: tpu_custom_call.1
= control target key start
LH: loop header
LB: loop body
LE: loop exit
PB: predicated region body
PF: predicated region fallthrough
CT: control target
= control target key end

     0   :  { %10 = vsyncpa [#allocation3], 0  ;;  %s626_s0 = inlined_call_operand.vmem [shape: f32[2,4,256], index: 0, kind: input, shape index: {}]   ;;  %s627_s1 = inlined_call_operand.vmem [shape: f32[4,2], index: 1, kind: input, shape index: {}]   ;;  %s628_s2 = inlined_call_operand.vmem [shape: f32[1,2], index: 2, kind: input, shape index: {}]   ;;  %s629_s3 = inlined_call_operand.vmem [shape: f32[4,2], index: 3, kind: input, shape index: {}]   ;;  %s630_s4 = inlined_call_operand.vmem [shape: f32[4,1], index: 4, kind: input, shape index: {}]   ;;  %s631_s5 = inlined_call_operand.hbm [shape: f32[2,4,256], index: 5, kind: output, shape index: {}]  }
   0x1   :  { %12 = vsyncpa [#allocation3 + $0x1], 0  ;;  %s512_s18 = smov 0   ;;  %s514_s19 = smov 0  }
   0x2   :  { %s516_s20 = smov 0   ;;  %s518_s21 = smov 0  }
   0x3 LB: > { %s533_s22 = sadd.s32 4294967295, %s477_s21   ;;  %s352_s23 = sadd.s32 4294967294, %s477_s21   ;;  %s477_s21 = sphi %s518_s21, %s637_s21   ;;  %s473_s20 = sphi %s516_s20, %s636_s20   ;;  %s469_s19 = sphi %s514_s19, %s635_s19   ;;  %s465_s18 = sphi %s512_s18, %s634_s18  }
   0x4   : > { %s537_s24 = sadd.s32 1, %s477_s21   ;;  %s135_s25 = sadd.s32 1, %s473_s20 }
   0x5   : > { %s132_s26 = ssub.s32 %s477_s21, %s537_s24  ;;  %p145_p0 = scmp.ne.s32.totalorder %s473_s20, %s469_s19 }
   0x6   : > { %p133_p1 = scmp.eq.s32.totalorder %s132_s26, 0  ;;  %p146_p2 = scmp.eq.s32.totalorder %s533_s22, 1 }
   0x7   : > { %p151_p3 = scmp.ne.s32.totalorder %s469_s19, %s465_s18  ;;  %p152_p4 = scmp.eq.s32.totalorder %s352_s23, 1 }
   0x8   : > { %s548_s27 = scalar_select %p133_p1, %s473_s20, %s135_s25  }
   0x9   : > { %p550_p5 = por %p146_p2, %p145_p0  ;;  %p554_p6 = por %p152_p4, %p151_p3 }
   0xa   : > { %p355_p7 = scmp.ge.s32.totalorder %s477_s21, 1  ;;  %p190_p8 = scmp.lt.s32.totalorder %s477_s21, 3 }
   0xc   : > { %p191_p9 = pnand %p355_p7, %p190_p8 }
   0xd   : > { %p218_p10 = scmp.lt.s32.totalorder (!%p191_p9), %s533_s22, 1  ;;  %vm227_vm0 = vcmask (!%p191_p9), 1043456   ;;  %v234_v5 = vld [vmem:[%s627_s1] sm:$0xf] (!%p191_p9)  ;;  %vm239_vm1 = vcmask (!%p191_p9), 11264   ;;  %v249_v13 = vlaneseq (!%p191_p9)  ;;  %v479_v26 = vmov (!%p191_p9), 0  }
   0xe   : > { %194 = sbr.rel (%p191_p9) target bundleno = 515 (0x203), region = 40  ;;  %v235_v17 = vld [vmem:[%s628_s2] sm:$0x1] (!%p191_p9)  ;;  %408 = vset.pattern.permute.xlu1 (!%p191_p9), %v479_v26  ;;  %409 = vset.pattern.permute.xlu0 (!%p191_p9), %v479_v26  ;;  %v480_v34 = vmov (!%p191_p9), 839922192   ;;  %s215_s23 = sand.u32 (!%p191_p9), 1, %s469_s19  }
   0xf   : > { %v250_v16 = vshrl.u32 (!%p191_p9), %v249_v13, 7  ;;  %v236_v22 = vld [vmem:[%s629_s3] sm:$0xf] (!%p191_p9)  ;;  %v269_v35 = vunpack.c.l.s4 (!%p191_p9), %v480_v34  ;;  %s356_s25 = sshll.u32 (!%p191_p9), %s215_s23, 3  ;;  %s366_s26 = sshll.u32 (!%p191_p9), %s533_s22, 7 }
  0x10   : > { %v237_v27 = vld [vmem:[%s630_s4] sm:$0xf] (!%p191_p9)  ;;  %s279_s10 = scalar_lea.sflag (!%p191_p9), [#allocation3], %s215_s23 }
  0x11   : > { %v251_v20 = vsub.s32 (!%p191_p9), 0, %v250_v16  ;;  %v270_v36 = vunpack.c.0.s8 (!%p191_p9), %v269_v35 }
  0x13   : > { %v273_v37 = vsub.s32 (!%p191_p9), %v270_v36, %v250_v16 }
  0x15   : > { %s219_s30 = scalar_select %p218_p10, %s533_s22, 1 }
  0x16   : > { %s481_s22 = smov [#allocation2]  }
  0x17   : > { %s365_s6 = sshll.u32 %s219_s30, 3  ;;  %s217_s30 = scalar_lea.vmem [#allocation2], %s356_s25 }
  0x18   : > { %s222_s9 = scalar_lea.vmem %s626_s0, %s365_s6  ;;  %s293_s6 = sshll.u32 %s217_s30, 4  ;;  %s586_s6 = int_to_ptr.vmem [resolvable:$true] %s293_s6 }
  0x19   : > { %v223_v0 = vld [vmem:[%s222_s9] sm:$0xff]  ;;  %s584_s9 = scalar_lea.hbm %s631_s5, %s366_s26  ;;  %s415_s11 = scalar_lea.vmem %s586_s6, 128 }
  0x1a   : > { %v225_v1 = vcombine.high %v223_v0, %v223_v0  ;;  %v228_v2 = vsel %vm227_vm0, %v223_v0, 0.0  ;;  %p416_p11 = scmp.ne.s32.totalorder %s586_s6, %s415_s11  ;;  %s419_s12 = sshll.u32 %s481_s22, 4  ;;  %s420_s12 = int_to_ptr.vmem [resolvable:$false] %s419_s12 }
  0x1b   : > { %s421_s13 = scalar_lea.vmem %s420_s12, 256  ;;  %p422_p0 = scmp.lt.s32.totalorder %s586_s6, %s420_s12 }
  0x1c   : > { %v229_v3 = vsel %vm227_vm0, %v225_v1, 0.0  ;;  %p417_p12 = pnand %p416_p11, %p550_p5  ;;  %p423_p1 = scmp.lt.s32.totalorder %s421_s13, %s415_s11 }
  0x1d   : > { %v230_v4 = vadd.f32 %v229_v3, %v228_v2 }
  0x1e   : > { %p418_p13 = pneg %p417_p12  ;;  %p424_p2 = por %p423_p1, %p422_p0 }
  0x1f   : > { %231 = vadd.xlane.f32.xlu0 %v230_v4 }
  0x20   : > { %p425_p3 = pnand %p424_p2, %p418_p13 }
  0xac   : > { %v232_v6 = vpop.xlane.xlu0 %231 }
  0xad   : > { %v233_v7 = vmul.f32 0.00390625, %v232_v6 }
  0xaf   : > { %v238_v8 = vmul.f32 %v234_v5, %v233_v7 }
  0xb1   : > { %v240_v9 = vsel %vm239_vm1, %v238_v8, 0.0 }
  0xb2   : > { %v241_v10 = vrot.slane %v240_v9, 4 }
  0xb4   : > { %v242_v11 = vadd.f32 %v241_v10, %v240_v9 }
  0xb6   : > { %v243_v12 = vrot.slane %v242_v11, 2 }
  0xb8   : > { %v244_v14 = vadd.f32 %v243_v12, %v242_v11 }
  0xba   : > { %v245_v15 = vrot.slane %v244_v14, 1 }
  0xbc   : > { %v246_v18 = vadd.f32 %v245_v15, %v244_v14 }
  0xbe   : > { %v247_v19 = vadd.f32 %v246_v18, %v235_v17 }
  0xc0   : > { %v248_v21 = vmax.f32 %v247_v19, 0.0 }
  0xc2   : > { %v252_v23 = vrot.slane %v248_v21, %v251_v20 }
  0xc4   : > { %v253_v24 = vmul.f32 %v252_v23, %v236_v22 }
  0xc6   : > { %v254_v25 = vsel %vm239_vm1, %v253_v24, 0.0 }
  0xc7   : > { %255 = vadd.xlane.f32.xlu0 %v254_v25 }
 0x154   : > { %v256_v28 = vpop.xlane.xlu0 %255 }
 0x155   : > { %v257_v29 = vadd.f32 %v256_v28, %v237_v27 }
 0x157   : > { %v359_v30 = vmul.f32 -1.442695, %v257_v29 }
 0x159   : > { %411 = vpow2.f32 %v359_v30 }
 0x163   : > { %v412_v31 = vpop.eup %411 }
 0x164   : > { %v261_v32 = vadd.f32 1.0, %v412_v31 }
 0x166   : > { %413 = vrcp.f32 %v261_v32 }
 0x170   : > { %v414_v33 = vpop.eup %413 }
 0x171   : > { %266 = vperm.xlu1 %408, %v414_v33  }
 0x1f0   : > { %v267_v38 = vpop.permute.xlu1 %266 }
 0x1f1   : > { %v274_v39 = vrot.slane %v267_v38, %v273_v37 }
 0x1f3   : > { %v276_v40 = vmul.f32 %v274_v39, %v223_v0 }
 0x1f5   : > { %277 = vst [vmem:[%s217_s30] sm:$0xff] %v276_v40 }
 0x1f6   : > { %428 = shalt.err (!%p425_p3)
}
 0x1f7   : > { %s429_s14 = scalar_lea.hbm %s584_s9, 128  ;;  %s433_s17 = scalar_lea.hbm %s631_s5, 256 }
 0x1f8   : > { %p430_p4 = scmp.ne.s32.totalorder %s584_s9, %s429_s14  ;;  %p434_p9 = scmp.lt.u32.totalorder %s584_s9, %s631_s5 }
 0x1f9   : > { %p435_p10 = scmp.lt.u32.totalorder %s433_s17, %s429_s14  ;;  %p437_p12 = scmp.lt.u32.totalorder %s429_s14, %s584_s9 }
 0x1fa   : > { %p431_p7 = pnand %p430_p4, %p550_p5 }
 0x1fb   : > { %p436_p11 = por %p435_p10, %p434_p9 }
 0x1fc   : > { %p432_p8 = pneg %p431_p7 }
 0x1fd   : > { %p438_p13 = por %p437_p12, %p436_p11 }
 0x1ff   : > { %p439_p0 = pnand %p438_p13, %p432_p8 }
 0x201   : > { %442 = shalt.err (!%p439_p0)
}
 0x202   : > { %367 = dma.vmem_to_hbm [thread:$0]  (%p550_p5), %s586_s6, 128, %s584_s9, %s279_s10  }
 0x203 PF: > { %p373_p1 = scmp.ge.s32.totalorder %s477_s21, 2  ;;  %s305_s26 = sand.u32 1, %s465_s18  }
 0x204   : > { %s306_s30 = scalar_lea.sflag [#allocation3], %s305_s26 }
 0x205   : > { %p370_p2 = pnand %p373_p1, %p554_p6 }
 0x207   : > { %460 = dma.done.wait (!%p370_p2), %s306_s30, 128  }
 0x208   : > { %462 = vsyncadd (!%p370_p2), %s306_s30, 4294967168  ;;  %p15_p3 = scmp.ge.s32.totalorder %s537_s24, 4   ;;  %s634_s18 = smov %s469_s19 }
 0x209   : > { %s635_s19 = smov %s473_s20  ;;  %s636_s20 = smov %s548_s27 }
 0x20a   : > { %s637_s21 = smov %s537_s24  ;;  %17 = sbr.rel (!%p15_p3) target bundleno = 3 (0x3), region = 75 }
 0x211   :  { %311 = vsyncpa [#allocation3], 1 }
 0x212   :  { %313 = vsyncpa [#allocation3 + $0x1], 1 }

</bundles_post_ra>
